<compile_context>
chip_gen: v7x
topology: tpu7x:2x2x1
jax: 0.10.0
libtpu: 0.0.40
codegen_flags: <defaults>
</compile_context>

<pallas_src>
import jax
import jax.numpy as jnp
from jax.experimental import pallas as pl
from jax.experimental.pallas import tpu as pltpu


def _sublane(dtype):
    # sublane packing: 8 for 4-byte, 16 for 2-byte, 32 for 1-byte dtypes
    return max(8, 32 // jnp.dtype(dtype).itemsize)


def _vmem_budget():
    """Generation-aware (vmem_limit_bytes, per-tile target bytes)."""
    cap = 64 * 1024 * 1024  # conservative default (v7x physical VMEM)
    try:
        info = pltpu.get_tpu_info()
        cap = int(getattr(info, "vmem_capacity_bytes", cap))
    except Exception:
        pass
    limit = min(max(cap // 2, 32 * 1024 * 1024), 64 * 1024 * 1024)
    # 4 live buffers (2x in + 2x out) -> tile target = limit / 8, >= 2 MiB.
    target = max(2 * 1024 * 1024, limit // 8)
    return limit, target


def _pick_row_block(num_rows, row_bytes, sublane, target_bytes):
    """Sublane-multiple row block sized for ~target_bytes input tiles."""
    rb = (target_bytes // max(1, row_bytes)) // sublane * sublane
    rb = max(sublane, rb)
    if rb >= num_rows:
        return int(num_rows)  # single full-extent block (always legal)
    return int(rb)


def _split_kernel(x_ref, o_ref):
    """Fast path: grid axis 1 is the channel remainder r; r == 0 is all zeros."""
    r = pl.program_id(1)

    @pl.when(r == 0)
    def _zero():
        o_ref[...] = jnp.zeros_like(o_ref)

    @pl.when(r != 0)
    def _copy():
        o_ref[...] = x_ref[...]


def _make_flat_kernel(hw, c, p):
    """Lane-dense general path: keep mask from the global flat element index."""

    def kernel(x_ref, o_ref):
        shp = x_ref.shape  # (rb, 128)
        row0 = pl.program_id(0) * shp[0]
        rows = jax.lax.broadcasted_iota(jnp.int32, shp, 0) + row0
        lanes = jax.lax.broadcasted_iota(jnp.int32, shp, 1)
        ch = ((rows * shp[1] + lanes) // hw) % c
        keep = (ch % p) != 0
        x = x_ref[...]
        # jnp.where (not multiply) so masked positions are exact zeros even
        # if x contains NaN/Inf, matching the PyTorch module.
        o_ref[...] = jnp.where(keep, x, jnp.zeros_like(x))

    return kernel


def _make_row_kernel(c, p):
    """Row fallback: per-row keep mask from an in-kernel row iota."""

    def kernel(x_ref, o_ref):
        rb = x_ref.shape[0]
        row0 = pl.program_id(0) * rb
        rows = jax.lax.broadcasted_iota(jnp.int32, (rb, 1), 0) + row0
        keep = ((rows % c) % p) != 0  # row index (n*c + ci) -> channel ci
        x = x_ref[...]
        o_ref[...] = jnp.where(keep, x, jnp.zeros_like(x))

    return kernel


def perturb_mask(x, p):
    """Pallas implementation of PerturbMask.forward for NCHW input x."""
    n, c, h, w = x.shape
    hw = h * w
    dt = x.dtype
    itemsize = jnp.dtype(dt).itemsize
    sub = _sublane(dt)
    total = n * c * hw
    total_bytes = total * itemsize
    vmem_limit, tile_target = _vmem_budget()

    if p >= 2 and c % p == 0 and hw % 128 == 0:
        # ---- fast path: skip reading the zeroed channels ----
        g = c // p
        rows = n * g
        # (N, C, H, W) -> (N*G, p*HW); chunk r*hw:(r+1)*hw of a row is channel
        # remainder r (channel = g*p + r).  Remainder 0 is the zeroed slab.
        x2 = x.reshape(rows, p * hw)
        rb = _pick_row_block(rows, hw * itemsize, sub, tile_target)
        grid = (pl.cdiv(rows, rb), p)
        out2 = pl.pallas_call(
            _split_kernel,
            out_shape=jax.ShapeDtypeStruct((rows, p * hw), dt),
            grid=grid,
            in_specs=[
                # For r == 0 revisit the r == 1 block; the kernel never reads
                # it and the repeated DMA is elided on the next step.
                pl.BlockSpec((rb, hw), lambda i, r: (i, jnp.maximum(r, 1))),
            ],
            out_specs=pl.BlockSpec((rb, hw), lambda i, r: (i, r)),
            compiler_params=pltpu.CompilerParams(
                dimension_semantics=("parallel", "arbitrary"),
                vmem_limit_bytes=vmem_limit,
            ),
            cost_estimate=pl.CostEstimate(
                flops=0,
                transcendentals=0,
                bytes_accessed=total_bytes + (total_bytes * (p - 1)) // p,
            ),
        )(x2)
        return out2.reshape(n, c, h, w)

    if total % 128 == 0:
        # ---- lane-dense general path (covers ragged H*W when total | 128) ----
        lane = 128
        rows = total // lane
        x2 = x.reshape(rows, lane)
        rb = _pick_row_block(rows, lane * itemsize, sub, tile_target)
        grid = (pl.cdiv(rows, rb),)
        out2 = pl.pallas_call(
            _make_flat_kernel(hw, c, p),
            out_shape=jax.ShapeDtypeStruct((rows, lane), dt),
            grid=grid,
            in_specs=[pl.BlockSpec((rb, lane), lambda i: (i, 0))],
            out_specs=pl.BlockSpec((rb, lane), lambda i: (i, 0)),
            compiler_params=pltpu.CompilerParams(
                dimension_semantics=("parallel",),
                vmem_limit_bytes=vmem_limit,
            ),
            cost_estimate=pl.CostEstimate(
                flops=0, transcendentals=0, bytes_accessed=2 * total_bytes
            ),
        )(x2)
        return out2.reshape(n, c, h, w)

    # ---- row fallback: (N*C, H*W) tiles, per-row in-kernel keep mask ----
    rows = n * c
    x2 = x.reshape(rows, hw)
    rb = _pick_row_block(rows, hw * itemsize, sub, tile_target)
    grid = (pl.cdiv(rows, rb),)
    out2 = pl.pallas_call(
        _make_row_kernel(c, p),
        out_shape=jax.ShapeDtypeStruct((rows, hw), dt),
        grid=grid,
        in_specs=[pl.BlockSpec((rb, hw), lambda i: (i, 0))],
        out_specs=pl.BlockSpec((rb, hw), lambda i: (i, 0)),
        compiler_params=pltpu.CompilerParams(
            dimension_semantics=("parallel",),
            vmem_limit_bytes=vmem_limit,
        ),
        cost_estimate=pl.CostEstimate(
            flops=0, transcendentals=0, bytes_accessed=2 * total_bytes
        ),
    )(x2)
    return out2.reshape(n, c, h, w)


def perturb_mask_ref(x, p):
    """Pure-JAX reference matching the PyTorch module."""
    n, c, h, w = x.shape
    keep = (jnp.arange(c) % p) != 0
    return jnp.where(keep[None, :, None, None], x, jnp.zeros_like(x))


if __name__ == "__main__":
    key = jax.random.PRNGKey(0)

    # Case 1: fast path (p | C, H*W multiple of 128) -- module-spec-like shapes.
    x1 = jax.random.normal(key, (2, 4, 16, 16), dtype=jnp.float32)
    out1 = jax.block_until_ready(perturb_mask(x1, 2))
    ref1 = perturb_mask_ref(x1, 2)
    assert out1.shape == x1.shape and out1.dtype == x1.dtype
    assert jnp.allclose(out1, ref1), "fast-path mismatch vs reference (p=2)"

    # Case 2: lane-dense general path (p does not divide C).
    out2 = jax.block_until_ready(perturb_mask(x1, 3))
    ref2 = perturb_mask_ref(x1, 3)
    assert jnp.allclose(out2, ref2), "lane-dense general-path mismatch (p=3)"

    # Case 3: row-fallback path (ragged H*W, total not a multiple of 128).
    x3 = jax.random.normal(jax.random.PRNGKey(1), (2, 6, 14, 14), dtype=jnp.float32)
    out3 = jax.block_until_ready(perturb_mask(x3, 2))
    ref3 = perturb_mask_ref(x3, 2)
    assert jnp.allclose(out3, ref3), "row-fallback mismatch vs reference (ragged HW)"

    # Case 4: degenerate p=1 (all channels zeroed) through the general path.
    out4 = jax.block_until_ready(perturb_mask(x1, 1))
    assert jnp.allclose(out4, jnp.zeros_like(x1)), "p=1 should zero everything"

    print("KERNEL_OK")
</pallas_src>

<mosaic_0001>
module attributes {stable_mosaic.version = 11 : i64} {
  func.func @_split_kernel(%arg0: i32, %arg1: i32, %arg2: memref<4x256xf32, #tpu.memory_space<vmem>>, %arg3: memref<4x256xf32, #tpu.memory_space<vmem>>) attributes {dimension_semantics = [#tpu.dimension_semantics<parallel>, #tpu.dimension_semantics<arbitrary>], iteration_bounds = array<i64: 1, 2>, scalar_prefetch = 0 : i64, scratch_operands = 0 : i64, tpu.core_type = #tpu.core_type<tc>, window_params = [{transform_indices = @transform_0, window_bounds = array<i64: 4, 256>}, {transform_indices = @transform_1, window_bounds = array<i64: 4, 256>}]} {
    %c0_i32 = arith.constant 0 : i32
    %0 = arith.cmpi eq, %arg1, %c0_i32 : i32
    %1 = arith.extui %0 : i1 to i32
    %c0_i32_0 = arith.constant 0 : i32
    %2 = arith.cmpi ne, %1, %c0_i32_0 : i32
    scf.if %2 {
      %cst = arith.constant 0.000000e+00 : f32
      %6 = vector.broadcast %cst : f32 to vector<4x256xf32>
      %c0 = arith.constant 0 : index
      %c0_3 = arith.constant 0 : index
      %7 = vector.load %arg3[%c0, %c0_3] : memref<4x256xf32, #tpu.memory_space<vmem>>, vector<4x256xf32>
      tpu.vector_store %arg3[%c0, %c0_3], %6 {strides = array<i32>} : memref<4x256xf32, #tpu.memory_space<vmem>>, vector<4x256xf32>,
    } else {
    }
    %c0_i32_1 = arith.constant 0 : i32
    %3 = arith.cmpi ne, %arg1, %c0_i32_1 : i32
    %4 = arith.extui %3 : i1 to i32
    %c0_i32_2 = arith.constant 0 : i32
    %5 = arith.cmpi ne, %4, %c0_i32_2 : i32
    scf.if %5 {
      %c0 = arith.constant 0 : index
      %c0_3 = arith.constant 0 : index
      %6 = vector.load %arg2[%c0, %c0_3] : memref<4x256xf32, #tpu.memory_space<vmem>>, vector<4x256xf32>
      %c0_4 = arith.constant 0 : index
      %c0_5 = arith.constant 0 : index
      %7 = vector.load %arg3[%c0_4, %c0_5] : memref<4x256xf32, #tpu.memory_space<vmem>>, vector<4x256xf32>
      tpu.vector_store %arg3[%c0_4, %c0_5], %6 {strides = array<i32>} : memref<4x256xf32, #tpu.memory_space<vmem>>, vector<4x256xf32>,
    } else {
    }
    return
  }
  func.func @transform_0(%arg0: i32, %arg1: i32) -> (i32, i32) {
    %c1_i32 = arith.constant 1 : i32
    %0 = arith.maxsi %arg1, %c1_i32 : i32
    %c0_i32 = arith.constant 0 : i32
    return %arg0, %0 : i32, i32
  }
  func.func @transform_1(%arg0: i32, %arg1: i32) -> (i32, i32) {
    %c0_i32 = arith.constant 0 : i32
    return %arg0, %arg1 : i32, i32
  }
}

</mosaic_0001>

<bundles_post_ra>
// kernel: tpu_custom_call.1
= control target key start
LH: loop header
LB: loop body
LE: loop exit
PB: predicated region body
PF: predicated region fallthrough
CT: control target
= control target key end

     0   :  { %6 = vsyncpa [#allocation3], 0  ;;  %s692_s0 = inlined_call_operand.hbm [shape: f32[4,512], index: 0, kind: input, shape index: {}]   ;;  %s693_s1 = inlined_call_operand.hbm [shape: f32[4,512], index: 1, kind: output, shape index: {}]  }
   0x1   :  { %8 = vsyncpa [#allocation3 + $0x1], 0 }
   0x2   :  { %9 = vsyncpa [#allocation4], 0 }
   0x3   :  { %11 = vsyncpa [#allocation4 + $0x1], 0  ;;  %s528_s6 = smov 0   ;;  %s530_s7 = smov 0  }
   0x4   :  { %s532_s8 = smov 0   ;;  %s534_s9 = smov 0  }
   0x5   :  { %s536_s10 = smov 0   ;;  %s538_s11 = smov 0  }
   0x6   :  { %s540_s12 = smov 0   ;;  %s542_s13 = smov 0  }
   0x7 LB: > { %s273_s14 = sadd.s32 4294967295, %s513_s13   ;;  %s274_s15 = sadd.s32 4294967294, %s513_s13   ;;  %s513_s13 = sphi %s542_s13, %s17_s13   ;;  %s509_s12 = sphi %s540_s12, %s714_s12   ;;  %s505_s11 = sphi %s538_s11, %s713_s11   ;;  %s501_s10 = sphi %s536_s10, %s682_s10   ;;  %s497_s9 = sphi %s534_s9, %s712_s9   ;;  %s493_s8 = sphi %s532_s8, %s711_s8   ;;  %s489_s7 = sphi %s530_s7, %s710_s7   ;;  %s485_s6 = sphi %s528_s6, %s709_s6  }
   0x8   : > { %s26_s16 = sadd.s32 1, %s509_s12  ;;  %p482_p1 = scmp.ne.s32.totalorder %s501_s10, 0 }
   0x9   : > { %p27_p0 = scmp.ge.s32.totalorder %s26_s16, 2  ;;  %p50_p2 = scmp.eq.s32.totalorder %s513_s13, 0 }
   0xa   : > { %p55_p3 = scmp.ne.s32.totalorder %s501_s10, %s497_s9  ;;  %p56_p5 = scmp.eq.s32.totalorder %s273_s14, 0 }
   0xb   : > { %s716_s16 = smov (%p27_p0, %s26_s16), 0  ;;  %p574_p4 = por %p482_p1, %p50_p2 }
   0xc   : > { %p578_p6 = por %p56_p5, %p55_p3  ;;  %s66_s19 = ssub.s32 %s509_s12, %s716_s16 }
   0xd   : > { %p68_p7 = scmp.eq.s32.totalorder %s66_s19, 0  ;;  %s70_s20 = sadd.s32 1, %s493_s8 }
   0xe   : > { %s698_s18 = scalar_select %p578_p6, 1, 0 }
   0xf   : > { %s586_s21 = scalar_select %p68_p7, %s493_s8, %s70_s20  }
  0x10   : > { %p80_p8 = scmp.ne.s32.totalorder %s493_s8, %s489_s7  ;;  %p81_p9 = scmp.eq.s32.totalorder %s273_s14, 1 }
  0x11   : > { %p86_p10 = scmp.ne.s32.totalorder %s489_s7, %s485_s6  ;;  %p87_p11 = scmp.eq.s32.totalorder %s274_s15, 1 }
  0x12   : > { %p592_p12 = por %p81_p9, %p80_p8  ;;  %p304_p1 = scmp.lt.s32.totalorder %s513_s13, 2 }
  0x13   : > { %p597_p0 = por %p87_p11, %p86_p10  ;;  %s605_s26 = scalar_lea.hbm %s692_s0, 128 }
  0x14   : > { %s699_s22 = scalar_select %p592_p12, 1, 0 }
  0x15   : > { %s700_s23 = scalar_select %p597_p0, 1, 0 }
  0x16   : > { %s515_s27 = smov [#allocation2]   ;;  %p609_p2 = pnand %p304_p1, %p574_p4 }
  0x17   : > { %s123_s28 = sshll.u32 %s515_s27, 4  ;;  %s481_s3 = scalar_lea.hbm %s692_s0, 256  ;;  %s124_s28 = int_to_ptr.vmem [resolvable:$true] %s123_s28 }
  0x18   : > { %s701_s29 = scalar_select %p609_p2, 1, 0 }
  0x19   : > { %p380_p7 = scmp.ne.s32.totalorder %s605_s26, %s481_s3  ;;  %p381_p8 = pneg %p609_p2 }
  0x1a   : > { %p385_p4 = scmp.lt.u32.totalorder %s605_s26, %s692_s0  ;;  %p386_p11 = scmp.lt.u32.totalorder %s481_s3, %s481_s3 }
  0x1b   : > { %p382_p9 = pnand %p381_p8, %p380_p7  ;;  %p388_p13 = scmp.lt.u32.totalorder %s481_s3, %s605_s26 }
  0x1c   : > { %p387_p1 = por %p386_p11, %p385_p4 }
  0x1d   : > { %p383_p10 = pneg %p382_p9 }
  0x1e   : > { %p389_p0 = por %p388_p13, %p387_p1 }
  0x20   : > { %p390_p12 = pnand %p389_p0, %p383_p10 }
  0x22   : > { %393 = shalt.err (!%p390_p12)
}
  0x23   : > { %s394_s9 = scalar_lea.vmem %s124_s28, 128  ;;  %s401_s14 = scalar_lea.vmem %s124_s28, 256 }
  0x24   : > { %p395_p3 = scmp.ne.s32.totalorder %s124_s28, %s394_s9  ;;  %p402_p2 = scmp.lt.s32.totalorder %s124_s28, %s124_s28 }
  0x25   : > { %p403_p7 = scmp.lt.s32.totalorder %s401_s14, %s394_s9 }
  0x26   : > { %p397_p5 = pnand %p395_p3, %p381_p8 }
  0x27   : > { %p404_p9 = por %p403_p7, %p402_p2 }
  0x28   : > { %p398_p6 = pneg %p397_p5 }
  0x2a   : > { %p405_p4 = pnand %p404_p9, %p398_p6 }
  0x2c   : > { %408 = shalt.err (!%p405_p4)
}
  0x2d   : > { %p702_p11 = scmp.ne.s32.totalorder %s701_s29, 0  ;;  %p703_p1 = scmp.lt.s32.totalorder %s513_s13, 3 }
  0x2e   : > { %p704_p13 = scmp.ge.s32.totalorder %s513_s13, 1 }
  0x2f   : > { %299 = dma.hbm_to_vmem [thread:$0]  (!%p702_p11), %s605_s26, 128, %s124_s28, [#allocation3]  }
  0x30   : > { %p129_p0 = pnand %p704_p13, %p703_p1 }
  0x31   : > { %s134_s15 = sand.u32 (!%p129_p0), 1, %s501_s10   ;;  %p705_p12 = scmp.ne.s32.totalorder (!%p129_p0), %s698_s18, 0 }
  0x32   : > { %132 = sbr.rel (%p129_p0) target bundleno = 101 (0x65), region = 24  ;;  %s281_s17 = sshll.u32 (!%p129_p0), %s134_s15, 3 }
  0x33   : > { %s135_s19 = scalar_lea.sflag (!%p129_p0), [#allocation3], %s134_s15  ;;  %s138_s20 = scalar_lea.vmem (!%p129_p0), [#allocation2], %s281_s17 }
  0x39   : > { %474 = dma.done.wait (%p705_p12), %s135_s19, 128  }
  0x3a   : > { %476 = vsyncadd (%p705_p12), %s135_s19, 4294967168  ;;  %s154_s24 = sand.u32 1, %s489_s7   ;;  %p283_p6 = scmp.ne.s32.totalorder %s505_s11, 0 }
  0x3b   : > { %s282_s25 = sshll.u32 %s154_s24, 3  ;;  %v516_v0 = vmov (!%p283_p6), 0.0  }
  0x3c   : > { %s156_s27 = scalar_lea.vmem [#allocation5], %s282_s25  ;;  %164 = sbr.rel (%p283_p6) target bundleno = 67 (0x43), region = 32 }
  0x3d   : > { %165 = vst [vmem:[%s156_s27] sm:$0xff] (!%p283_p6), %v516_v0 }
  0x43 PF: > { %p284_p2 = scmp.eq.s32.totalorder %s505_s11, 0 }
  0x44   : > { %v170_v1 = vld [vmem:[%s138_s20] sm:$0xff] (!%p284_p2) }
  0x45   : > { %169 = sbr.rel (%p284_p2) target bundleno = 76 (0x4c), region = 36  ;;  %171 = vst [vmem:[%s156_s27] sm:$0xff] (!%p284_p2), %v170_v1 }
  0x4c PF: > { %s291_s18 = sshll.u32 %s505_s11, 7  ;;  %s189_s30 = sshll.u32 %s156_s27, 4  ;;  %s190_s30 = int_to_ptr.vmem [resolvable:$true] %s189_s30 }
  0x4d   : > { %s645_s29 = scalar_lea.hbm %s693_s1, %s291_s18  ;;  %s173_s2 = scalar_lea.sflag [#allocation4], %s154_s24 }
  0x4e   : > { %s409_s3 = scalar_lea.vmem %s190_s30, 128  ;;  %p706_p5 = scmp.ne.s32.totalorder %s699_s22, 0 }
  0x4f   : > { %p410_p3 = scmp.ne.s32.totalorder %s190_s30, %s409_s3  ;;  %s517_s4 = smov [#allocation5]  }
  0x50   : > { %s413_s5 = sshll.u32 %s517_s4, 4  ;;  %s414_s5 = int_to_ptr.vmem [resolvable:$false] %s413_s5 }
  0x51   : > { %p411_p8 = pnand %p410_p3, %p706_p5  ;;  %s415_s9 = scalar_lea.vmem %s414_s5, 256 }
  0x52   : > { %p416_p7 = scmp.lt.s32.totalorder %s190_s30, %s414_s5  ;;  %p417_p9 = scmp.lt.s32.totalorder %s415_s9, %s409_s3 }
  0x53   : > { %p412_p10 = pneg %p411_p8 }
  0x54   : > { %p418_p4 = por %p417_p9, %p416_p7 }
  0x56   : > { %p419_p11 = pnand %p418_p4, %p412_p10 }
  0x58   : > { %422 = shalt.err (!%p419_p11)
}
  0x59   : > { %s423_s11 = scalar_lea.hbm %s645_s29, 128  ;;  %s427_s17 = scalar_lea.hbm %s693_s1, 256 }
  0x5a   : > { %p424_p1 = scmp.ne.s32.totalorder %s645_s29, %s423_s11  ;;  %p428_p12 = scmp.lt.u32.totalorder %s645_s29, %s693_s1 }
  0x5b   : > { %p429_p6 = scmp.lt.u32.totalorder %s427_s17, %s423_s11  ;;  %p431_p3 = scmp.lt.u32.totalorder %s423_s11, %s645_s29 }
  0x5c   : > { %p425_p13 = pnand %p424_p1, %p706_p5 }
  0x5d   : > { %p430_p2 = por %p429_p6, %p428_p12 }
  0x5e   : > { %p426_p0 = pneg %p425_p13 }
  0x5f   : > { %p432_p8 = por %p431_p3, %p430_p2 }
  0x61   : > { %p433_p10 = pnand %p432_p8, %p426_p0 }
  0x63   : > { %436 = shalt.err (!%p433_p10)
}
  0x64   : > { %294 = dma.vmem_to_hbm [thread:$0]  (%p706_p5), %s190_s30, 128, %s645_s29, %s173_s2  }
  0x65 PF: > { %s201_s24 = sand.u32 1, %s485_s6   ;;  %p707_p7 = scmp.ne.s32.totalorder %s700_s23, 0 }
  0x66   : > { %p708_p9 = scmp.ge.s32.totalorder %s513_s13, 2  ;;  %s202_s25 = scalar_lea.sflag [#allocation4], %s201_s24 }
  0x68   : > { %p301_p4 = pnand %p708_p9, %p707_p7 }
  0x6a   : > { %478 = dma.done.wait (!%p301_p4), %s202_s25, 128  }
  0x6b   : > { %480 = vsyncadd (!%p301_p4), %s202_s25, 4294967168  ;;  %s17_s13 = sadd.s32 1, %s513_s13   ;;  %s709_s6 = smov %s489_s7 }
  0x6c   : > { %p14_p11 = scmp.ge.s32.totalorder %s17_s13, 4   ;;  %s710_s7 = smov %s493_s8 }
  0x6d   : > { %s711_s8 = smov %s586_s21  ;;  %s712_s9 = smov %s501_s10 }
  0x6e   : > { %s682_s10 = smov 0   ;;  %s713_s11 = smov %s509_s12 }
  0x6f   : > { %s714_s12 = smov %s716_s16  ;;  %16 = sbr.rel (!%p14_p11) target bundleno = 7 (0x7), region = 77 }
  0x76   :  { %207 = vsyncpa [#allocation3], 1 }
  0x77   :  { %209 = vsyncpa [#allocation3 + $0x1], 1 }
  0x78   :  { %210 = vsyncpa [#allocation4], 1 }
  0x79   :  { %212 = vsyncpa [#allocation4 + $0x1], 1 }

</bundles_post_ra>
